<compile_context>
chip_gen: v6e
topology: v6e:2x2x1
jax: 0.10.0
libtpu: 0.0.40
codegen_flags: <defaults>
</compile_context>

<pallas_src>
import functools

import jax
import jax.numpy as jnp
from jax.experimental import pallas as pl
from jax.experimental.pallas import tpu as pltpu

_LANE = 128
_SUBLANE = 16          # bf16 packs 16 rows per vreg


def _round_up(x, m):
    return ((x + m - 1) // m) * m


def _cdiv(a, b):
    return (a + b - 1) // b


def _choose_n_tiling(n, tn_desired):
    """Lane-dense output tiling: tn multiple of 128, N padded UP to tn."""
    tn = max(_LANE, min(tn_desired - tn_desired % _LANE,
                        _round_up(n, _LANE)))
    return _round_up(n, tn), tn


def _choose_k_tile(k, tk_desired):
    """Largest multiple of 256 <= tk_desired dividing K, else full K.
    K must divide exactly: a ragged K tile would leak garbage into the
    accumulator of valid output rows."""
    unit = 256
    if k <= tk_desired or k % unit:
        return k
    t = tk_desired - tk_desired % unit
    while k % t:
        t -= unit
    return t


def _vmem_budget_bytes():
    """Physical VMEM minus ~25% headroom for Mosaic internal scratch."""
    try:
        cap = int(pltpu.get_tpu_info().vmem_capacity_bytes)
    except Exception:
        cap = 64 << 20                      # conservative (v7x per-TC)
    return cap - max(cap // 4, 8 << 20)


def _lora_linear_kernel(x_ref, wt_ref, b_ref, at_ref, bt_ref, o_ref,
                        acc_ref, down_ref, *, compute_dtype):
    """One (i, j, k) step of  out = x @ Wt + bias + (x @ At) @ (scaling*Bt).

    Grid = (M tiles, N tiles, K tiles).  Axes j and k MUST stay "arbitrary":
    the down-projection cache relies on j == 0 running first for each row
    tile, and the f32 accumulator on sequential k.
    """
    j = pl.program_id(1)
    k = pl.program_id(2)
    nk = pl.num_programs(2)

    x = x_ref[...].astype(compute_dtype)      # cast on the VPU, not in XLA

    @pl.when(k == 0)
    def _():
        acc_ref[...] = jnp.zeros_like(acc_ref)

    @pl.when((j == 0) & (k == 0))
    def _():
        down_ref[...] = jnp.zeros_like(down_ref)

    # Rank-r down-projection depends only on (i, k): accumulate it in f32
    # once per row tile and reuse across every N tile.
    @pl.when(j == 0)
    def _():
        down_ref[...] += jnp.dot(x, at_ref[...],
                                 preferred_element_type=jnp.float32)

    # Frozen base layer (MXU, f32 accumulation).
    acc_ref[...] += jnp.dot(x, wt_ref[...], preferred_element_type=jnp.float32)

    @pl.when(k == nk - 1)
    def _():
        acc = acc_ref[...]
        acc += jnp.dot(down_ref[...].astype(compute_dtype), bt_ref[...],
                       preferred_element_type=jnp.float32)
        acc += b_ref[...]
        o_ref[...] = acc.astype(o_ref.dtype)


def _linear_kernel(x_ref, wt_ref, b_ref, o_ref, acc_ref, *, compute_dtype):
    """Merged-adapter path: plain K-tiled (x @ Wt + bias)."""
    k = pl.program_id(2)

    @pl.when(k == 0)
    def _():
        acc_ref[...] = jnp.zeros_like(acc_ref)

    acc_ref[...] += jnp.dot(x_ref[...].astype(compute_dtype), wt_ref[...],
                            preferred_element_type=jnp.float32)

    @pl.when(k == pl.num_programs(2) - 1)
    def _():
        o_ref[...] = (acc_ref[...] + b_ref[...]).astype(o_ref.dtype)


def prepare_lora_weights(w, b, lora_a, lora_b, *, scaling,
                         compute_dtype=jnp.bfloat16, tn=512,
                         merge_adapter=False):
    """One-time preparation of the frozen operands (transpose, pad, cast,
    scaling fold) so the per-call path pays none of it.

    w: (N, K) Linear weight, b: (N,), lora_a: (r, K), lora_b: (N, r).
    Returns (wt, b2, at, bt):
      wt : (K, N_pad) = W^T (+ scaling * A^T @ B^T if merge_adapter)
      b2 : (1, N_pad) bias (f32)
      at : (K, R_pad) = A^T, rank padded to 128 lanes      (None when merged)
      bt : (R_pad, N_pad) = scaling * B^T                  (None when merged)
    N_pad is rounded UP to a multiple of min(tn, round_up(N,128)) so output
    stores stay lane-dense with few grid steps even for awkward N.
    """
    n, k = w.shape
    r = lora_a.shape[0]
    n_pad, _ = _choose_n_tiling(n, tn)
    r_pad = _round_up(r, _LANE)

    w_eff = w.astype(jnp.float32)
    if merge_adapter:
        w_eff = w_eff + scaling * (lora_b.astype(jnp.float32)
                                   @ lora_a.astype(jnp.float32))

    wt = jnp.zeros((k, n_pad), compute_dtype).at[:, :n].set(
        jnp.transpose(w_eff).astype(compute_dtype))
    b2 = jnp.zeros((1, n_pad), jnp.float32).at[0, :n].set(
        b.astype(jnp.float32))
    if merge_adapter:
        return wt, b2, None, None

    at = jnp.zeros((k, r_pad), compute_dtype).at[:, :r].set(
        jnp.transpose(lora_a).astype(compute_dtype))
    bt = jnp.zeros((r_pad, n_pad), compute_dtype).at[:r, :n].set(
        (scaling * jnp.transpose(lora_b)).astype(compute_dtype))
    return wt, b2, at, bt


def lora_wrapper_forward(x, wt, b2, at, bt, *, out_features,
                         tm=None, tn=512, tk=2048, out_dtype=None):
    """x: (..., K), prepared operands from prepare_lora_weights().
    Returns (..., out_features) = Linear(x) + scaling * ((x @ A^T) @ B^T)."""
    *lead, K = x.shape
    assert wt.shape[0] == K
    n_pad = wt.shape[1]
    compute_dtype = wt.dtype
    out_dtype = x.dtype if out_dtype is None else out_dtype
    merged = at is None

    M = 1
    for d in lead:
        M *= d
    x2 = x.reshape(M, K)                     # metadata-only; no cast / pad

    budget = _vmem_budget_bytes()

    # Row tile: W^T is re-streamed once per row tile, so arithmetic intensity
    # vs. W traffic = tm FLOP/byte.  1024 on 128 MiB parts, 512 on 64 MiB.
    if tm is None:
        tm = 1024 if budget > (64 << 20) else 512
    tm = min(tm, _round_up(max(M, 1), _SUBLANE))
    # Megacore (v7x): make sure the "parallel" M axis has >= 2 tiles.
    if M > 256 and _cdiv(M, tm) < 2:
        tm = _round_up(_cdiv(M, 2), _SUBLANE)

    # Output-column tile: lane-dense, divides n_pad (prepare used same rule).
    tn = max(_LANE, min(tn - tn % _LANE, n_pad))
    while n_pad % tn:
        tn -= _LANE

    # K tile: exact divisor of K (or full K).
    tk = _choose_k_tile(K, tk)

    x_b = jnp.dtype(x.dtype).itemsize
    cd_b = jnp.dtype(compute_dtype).itemsize
    out_b = jnp.dtype(out_dtype).itemsize
    r_pad = 0 if merged else at.shape[1]

    def vmem_needed(tm_, tk_):
        per = tm_ * tk_ * x_b + tk_ * tn * cd_b + tn * 4 + tm_ * tn * out_b
        scr = tm_ * tn * 4
        if not merged:
            per += tk_ * r_pad * cd_b + r_pad * tn * cd_b
            scr += tm_ * r_pad * 4
        return 2 * per + scr + (2 << 20)

    while vmem_needed(tm, tk) > budget and tk > 256 and K % (tk // 2) == 0:
        tk //= 2
    while vmem_needed(tm, tk) > budget and tm > 256:
        tm = _round_up(tm // 2, _SUBLANE)
    vmem_limit = int(min(max(vmem_needed(tm, tk), 32 << 20), budget))

    grid = (_cdiv(M, tm), n_pad // tn, K // tk)

    x_spec = pl.BlockSpec((tm, tk), lambda i, j, k: (i, k))
    wt_spec = pl.BlockSpec((tk, tn), lambda i, j, k: (k, j))
    b_spec = pl.BlockSpec((1, tn), lambda i, j, k: (0, j))
    out_spec = pl.BlockSpec((tm, tn), lambda i, j, k: (i, j))

    if merged:
        kernel = functools.partial(_linear_kernel, compute_dtype=compute_dtype)
        in_specs = [x_spec, wt_spec, b_spec]
        scratch = [pltpu.VMEM((tm, tn), jnp.float32)]
        operands = (x2, wt, b2)
    else:
        kernel = functools.partial(_lora_linear_kernel,
                                   compute_dtype=compute_dtype)
        in_specs = [x_spec, wt_spec, b_spec,
                    pl.BlockSpec((tk, r_pad), lambda i, j, k: (k, 0)),
                    pl.BlockSpec((r_pad, tn), lambda i, j, k: (0, j))]
        scratch = [pltpu.VMEM((tm, tn), jnp.float32),     # f32 accumulator
                   pltpu.VMEM((tm, r_pad), jnp.float32)]  # f32 x@A^T cache
        operands = (x2, wt, b2, at, bt)

    out2 = pl.pallas_call(
        kernel,
        out_shape=jax.ShapeDtypeStruct((M, n_pad), out_dtype),
        grid_spec=pltpu.PrefetchScalarGridSpec(
            num_scalar_prefetch=0,
            grid=grid,
            in_specs=in_specs,
            out_specs=out_spec,
            scratch_shapes=scratch,
        ),
        compiler_params=pltpu.CompilerParams(
            dimension_semantics=("parallel", "arbitrary", "arbitrary"),
            vmem_limit_bytes=vmem_limit,
        ),
    )(*operands)

    return out2[:, :out_features].reshape(*lead, out_features)


def _reference(x, w, b, lora_a, lora_b, scaling):
    return (jnp.einsum("...k,nk->...n", x, w) + b
            + scaling * jnp.einsum("...r,nr->...n",
                                   jnp.einsum("...k,rk->...r", x, lora_a),
                                   lora_b))


if __name__ == "__main__":
    key = jax.random.PRNGKey(0)

    # --- Test 1: small shapes consistent with an SD LoRA-wrapped projection.
    batch, seq, hidden, out_features, rank = 2, 8, 32, 32, 4
    alpha = 8.0
    scaling = alpha / rank

    k_x, k_w, k_b, k_a, k_bb, key = jax.random.split(key, 6)
    x = jax.random.normal(k_x, (batch, seq, hidden), dtype=jnp.float32)
    w = jax.random.normal(k_w, (out_features, hidden), jnp.float32) * 0.05
    b = jax.random.normal(k_b, (out_features,), jnp.float32) * 0.01
    lora_a = jax.random.normal(k_a, (rank, hidden), jnp.float32) * 0.05
    lora_b = jax.random.normal(k_bb, (out_features, rank), jnp.float32) * 0.05

    ref = _reference(x, w, b, lora_a, lora_b, scaling)

    # Unmerged (hot-swappable adapter) path.
    wt, b2, at, bt = prepare_lora_weights(w, b, lora_a, lora_b,
                                          scaling=scaling)
    y = jax.block_until_ready(
        lora_wrapper_forward(x, wt, b2, at, bt, out_features=out_features))
    assert y.shape == (batch, seq, out_features)
    assert jnp.allclose(y, ref, atol=2e-2, rtol=2e-2), \
        float(jnp.max(jnp.abs(y - ref)))

    # Merged (static adapter) serving path.
    wt_m, b2_m, at_m, bt_m = prepare_lora_weights(
        w, b, lora_a, lora_b, scaling=scaling, merge_adapter=True)
    y_m = jax.block_until_ready(
        lora_wrapper_forward(x, wt_m, b2_m, at_m, bt_m,
                             out_features=out_features))
    assert jnp.allclose(y_m, ref, atol=2e-2, rtol=2e-2), \
        float(jnp.max(jnp.abs(y_m - ref)))

    # --- Test 2: multi-tile path (ragged M, 2 N tiles, 2 K tiles).
    batch2, seq2, hidden2, out2_f, rank2 = 2, 40, 512, 768, 8
    scaling2 = 16.0 / rank2
    k_x, k_w, k_b, k_a, k_bb, key = jax.random.split(key, 6)
    x2 = jax.random.normal(k_x, (batch2, seq2, hidden2), jnp.float32)
    w2 = jax.random.normal(k_w, (out2_f, hidden2), jnp.float32) * 0.02
    b2v = jax.random.normal(k_b, (out2_f,), jnp.float32) * 0.01
    a2 = jax.random.normal(k_a, (rank2, hidden2), jnp.float32) * 0.02
    bb2 = jax.random.normal(k_bb, (out2_f, rank2), jnp.float32) * 0.02

    ref2 = _reference(x2, w2, b2v, a2, bb2, scaling2)
    wt2, bb2p, at2, bt2 = prepare_lora_weights(w2, b2v, a2, bb2,
                                               scaling=scaling2)
    y2 = jax.block_until_ready(
        lora_wrapper_forward(x2, wt2, bb2p, at2, bt2, out_features=out2_f,
                             tm=32, tk=256))
    assert y2.shape == (batch2, seq2, out2_f)
    assert jnp.allclose(y2, ref2, atol=5e-2, rtol=5e-2), \
        float(jnp.max(jnp.abs(y2 - ref2)))

    print("KERNEL_OK")
</pallas_src>

<mosaic_0001>
module attributes {stable_mosaic.version = 11 : i64} {
  func.func @_lora_linear_kernel(%arg0: i32, %arg1: i32, %arg2: i32, %arg3: memref<16x32xf32, #tpu.memory_space<vmem>>, %arg4: memref<32x128xbf16, #tpu.memory_space<vmem>>, %arg5: memref<1x128xf32, #tpu.memory_space<vmem>>, %arg6: memref<32x128xbf16, #tpu.memory_space<vmem>>, %arg7: memref<128x128xbf16, #tpu.memory_space<vmem>>, %arg8: memref<16x128xf32, #tpu.memory_space<vmem>>, %arg9: memref<16x128xf32, #tpu.memory_space<vmem>>, %arg10: memref<16x128xf32, #tpu.memory_space<vmem>>) attributes {dimension_semantics = [#tpu.dimension_semantics<parallel>, #tpu.dimension_semantics<arbitrary>, #tpu.dimension_semantics<arbitrary>], iteration_bounds = array<i64: 1, 1, 1>, scalar_prefetch = 0 : i64, scratch_operands = 2 : i64, tpu.core_type = #tpu.core_type<tc>, window_params = [{transform_indices = @transform_0, window_bounds = array<i64: 16, 32>}, {transform_indices = @transform_1, window_bounds = array<i64: 32, 128>}, {transform_indices = @transform_2, window_bounds = array<i64: 1, 128>}, {transform_indices = @transform_3, window_bounds = array<i64: 32, 128>}, {transform_indices = @transform_4, window_bounds = array<i64: 128, 128>}, {transform_indices = @transform_5, window_bounds = array<i64: 16, 128>}]} {
    %c0 = arith.constant 0 : index
    %c0_0 = arith.constant 0 : index
    %0 = vector.load %arg3[%c0, %c0_0] : memref<16x32xf32, #tpu.memory_space<vmem>>, vector<16x32xf32>
    %1 = arith.truncf %0 : vector<16x32xf32> to vector<16x32xbf16>
    %c0_i32 = arith.constant 0 : i32
    %2 = arith.cmpi eq, %arg2, %c0_i32 : i32
    %3 = arith.extui %2 : i1 to i32
    %c0_i32_1 = arith.constant 0 : i32
    %4 = arith.cmpi ne, %3, %c0_i32_1 : i32
    scf.if %4 {
      %cst_15 = arith.constant 0.000000e+00 : f32
      %21 = vector.broadcast %cst_15 : f32 to vector<16x128xf32>
      %c0_16 = arith.constant 0 : index
      %c0_17 = arith.constant 0 : index
      %22 = vector.load %arg9[%c0_16, %c0_17] : memref<16x128xf32, #tpu.memory_space<vmem>>, vector<16x128xf32>
      tpu.vector_store %arg9[%c0_16, %c0_17], %21 {strides = array<i32>} : memref<16x128xf32, #tpu.memory_space<vmem>>, vector<16x128xf32>,
    } else {
    }
    %c0_i32_2 = arith.constant 0 : i32
    %5 = arith.cmpi eq, %arg1, %c0_i32_2 : i32
    %c0_i32_3 = arith.constant 0 : i32
    %6 = arith.cmpi eq, %arg2, %c0_i32_3 : i32
    %7 = arith.andi %5, %6 : i1
    %8 = arith.extui %7 : i1 to i32
    %c0_i32_4 = arith.constant 0 : i32
    %9 = arith.cmpi ne, %8, %c0_i32_4 : i32
    scf.if %9 {
      %cst_15 = arith.constant 0.000000e+00 : f32
      %21 = vector.broadcast %cst_15 : f32 to vector<16x128xf32>
      %c0_16 = arith.constant 0 : index
      %c0_17 = arith.constant 0 : index
      %22 = vector.load %arg10[%c0_16, %c0_17] : memref<16x128xf32, #tpu.memory_space<vmem>>, vector<16x128xf32>
      tpu.vector_store %arg10[%c0_16, %c0_17], %21 {strides = array<i32>} : memref<16x128xf32, #tpu.memory_space<vmem>>, vector<16x128xf32>,
    } else {
    }
    %c0_i32_5 = arith.constant 0 : i32
    %10 = arith.cmpi eq, %arg1, %c0_i32_5 : i32
    %11 = arith.extui %10 : i1 to i32
    %c0_i32_6 = arith.constant 0 : i32
    %12 = arith.cmpi ne, %11, %c0_i32_6 : i32
    scf.if %12 {
      %c0_15 = arith.constant 0 : index
      %c0_16 = arith.constant 0 : index
      %21 = vector.load %arg10[%c0_15, %c0_16] : memref<16x128xf32, #tpu.memory_space<vmem>>, vector<16x128xf32>
      %c0_17 = arith.constant 0 : index
      %c0_18 = arith.constant 0 : index
      %22 = vector.load %arg6[%c0_17, %c0_18] : memref<32x128xbf16, #tpu.memory_space<vmem>>, vector<32x128xbf16>
      %cst_19 = arith.constant dense<0.000000e+00> : vector<16x128xf32>
      %23 = tpu.matmul %1, %22, %cst_19 {dimension_numbers = #tpu.dot_dimension_numbers<[1], [0], [0], [1], [0, 0, 1, 1], [], []>} : vector<16x32xbf16>, vector<32x128xbf16>, vector<16x128xf32> -> vector<16x128xf32>
      %24 = arith.addf %21, %23 : vector<16x128xf32>
      %c0_20 = arith.constant 0 : index
      %c0_21 = arith.constant 0 : index
      %25 = vector.load %arg10[%c0_20, %c0_21] : memref<16x128xf32, #tpu.memory_space<vmem>>, vector<16x128xf32>
      tpu.vector_store %arg10[%c0_20, %c0_21], %24 {strides = array<i32>} : memref<16x128xf32, #tpu.memory_space<vmem>>, vector<16x128xf32>,
    } else {
    }
    %c0_7 = arith.constant 0 : index
    %c0_8 = arith.constant 0 : index
    %13 = vector.load %arg9[%c0_7, %c0_8] : memref<16x128xf32, #tpu.memory_space<vmem>>, vector<16x128xf32>
    %c0_9 = arith.constant 0 : index
    %c0_10 = arith.constant 0 : index
    %14 = vector.load %arg4[%c0_9, %c0_10] : memref<32x128xbf16, #tpu.memory_space<vmem>>, vector<32x128xbf16>
    %cst = arith.constant dense<0.000000e+00> : vector<16x128xf32>
    %15 = tpu.matmul %1, %14, %cst {dimension_numbers = #tpu.dot_dimension_numbers<[1], [0], [0], [1], [0, 0, 1, 1], [], []>} : vector<16x32xbf16>, vector<32x128xbf16>, vector<16x128xf32> -> vector<16x128xf32>
    %16 = arith.addf %13, %15 : vector<16x128xf32>
    %c0_11 = arith.constant 0 : index
    %c0_12 = arith.constant 0 : index
    %17 = vector.load %arg9[%c0_11, %c0_12] : memref<16x128xf32, #tpu.memory_space<vmem>>, vector<16x128xf32>
    tpu.vector_store %arg9[%c0_11, %c0_12], %16 {strides = array<i32>} : memref<16x128xf32, #tpu.memory_space<vmem>>, vector<16x128xf32>,
    %c0_i32_13 = arith.constant 0 : i32
    %18 = arith.cmpi eq, %arg2, %c0_i32_13 : i32
    %19 = arith.extui %18 : i1 to i32
    %c0_i32_14 = arith.constant 0 : i32
    %20 = arith.cmpi ne, %19, %c0_i32_14 : i32
    scf.if %20 {
      %c0_15 = arith.constant 0 : index
      %c0_16 = arith.constant 0 : index
      %21 = vector.load %arg9[%c0_15, %c0_16] : memref<16x128xf32, #tpu.memory_space<vmem>>, vector<16x128xf32>
      %c0_17 = arith.constant 0 : index
      %c0_18 = arith.constant 0 : index
      %22 = vector.load %arg10[%c0_17, %c0_18] : memref<16x128xf32, #tpu.memory_space<vmem>>, vector<16x128xf32>
      %23 = arith.truncf %22 : vector<16x128xf32> to vector<16x128xbf16>
      %c0_19 = arith.constant 0 : index
      %c0_20 = arith.constant 0 : index
      %24 = vector.load %arg7[%c0_19, %c0_20] : memref<128x128xbf16, #tpu.memory_space<vmem>>, vector<128x128xbf16>
      %cst_21 = arith.constant dense<0.000000e+00> : vector<16x128xf32>
      %25 = tpu.matmul %23, %24, %cst_21 {dimension_numbers = #tpu.dot_dimension_numbers<[1], [0], [0], [1], [0, 0, 1, 1], [], []>} : vector<16x128xbf16>, vector<128x128xbf16>, vector<16x128xf32> -> vector<16x128xf32>
      %26 = arith.addf %21, %25 : vector<16x128xf32>
      %c0_22 = arith.constant 0 : index
      %c0_23 = arith.constant 0 : index
      %27 = vector.load %arg5[%c0_22, %c0_23] : memref<1x128xf32, #tpu.memory_space<vmem>>, vector<1x128xf32>
      %28 = vector.broadcast %27 : vector<1x128xf32> to vector<16x128xf32>
      %29 = arith.addf %26, %28 : vector<16x128xf32>
      %c0_24 = arith.constant 0 : index
      %c0_25 = arith.constant 0 : index
      %30 = vector.load %arg8[%c0_24, %c0_25] : memref<16x128xf32, #tpu.memory_space<vmem>>, vector<16x128xf32>
      tpu.vector_store %arg8[%c0_24, %c0_25], %29 {strides = array<i32>} : memref<16x128xf32, #tpu.memory_space<vmem>>, vector<16x128xf32>,
    } else {
    }
    return
  }
  func.func @transform_0(%arg0: i32, %arg1: i32, %arg2: i32) -> (i32, i32) {
    %c0_i32 = arith.constant 0 : i32
    return %arg0, %arg2 : i32, i32
  }
  func.func @transform_1(%arg0: i32, %arg1: i32, %arg2: i32) -> (i32, i32) {
    %c0_i32 = arith.constant 0 : i32
    return %arg2, %arg1 : i32, i32
  }
  func.func @transform_2(%arg0: i32, %arg1: i32, %arg2: i32) -> (i32, i32) {
    %c0_i32 = arith.constant 0 : i32
    %c0_i32_0 = arith.constant 0 : i32
    return %c0_i32, %arg1 : i32, i32
  }
  func.func @transform_3(%arg0: i32, %arg1: i32, %arg2: i32) -> (i32, i32) {
    %c0_i32 = arith.constant 0 : i32
    %c0_i32_0 = arith.constant 0 : i32
    return %arg2, %c0_i32 : i32, i32
  }
  func.func @transform_4(%arg0: i32, %arg1: i32, %arg2: i32) -> (i32, i32) {
    %c0_i32 = arith.constant 0 : i32
    %c0_i32_0 = arith.constant 0 : i32
    return %c0_i32, %arg1 : i32, i32
  }
  func.func @transform_5(%arg0: i32, %arg1: i32, %arg2: i32) -> (i32, i32) {
    %c0_i32 = arith.constant 0 : i32
    return %arg0, %arg1 : i32, i32
  }
}

</mosaic_0001>

<bundles_post_ra>
// kernel: tpu_custom_call.1
= control target key start
LH: loop header
LB: loop body
LE: loop exit
PB: predicated region body
PF: predicated region fallthrough
CT: control target
= control target key end

     0   :  { %10 = vsyncpa [#allocation5], 0  ;;  %s651_s0 = inlined_call_operand.hbm [shape: f32[16,32], index: 0, kind: input, shape index: {}]   ;;  %s652_s1 = inlined_call_operand.hbm [shape: bf16[32,128], index: 1, kind: input, shape index: {}]   ;;  %s653_s2 = inlined_call_operand.vmem [shape: f32[1,128], index: 2, kind: input, shape index: {}]   ;;  %s654_s3 = inlined_call_operand.hbm [shape: bf16[32,128], index: 3, kind: input, shape index: {}]   ;;  %s655_s4 = inlined_call_operand.hbm [shape: bf16[128,128], index: 4, kind: input, shape index: {}]   ;;  %s656_s5 = inlined_call_operand.hbm [shape: f32[16,128], index: 5, kind: output, shape index: {}]  }
   0x1   :  { %11 = vsyncpa [#allocation8], 0 }
   0x2   :  { %12 = vsyncpa [#allocation11], 0 }
   0x3   :  { %13 = vsyncpa [#allocation6], 0  ;;  %s572_s18 = smov [#allocation7]  }
   0x4   :  { %s31_s19 = sshll.u32 %s572_s18, 4  ;;  %s32_s19 = int_to_ptr.vmem [resolvable:$true] %s31_s19 }
   0x5   :  { %s472_s20 = scalar_lea.vmem %s32_s19, 256  ;;  %p477_p1 = scmp.lt.s32.totalorder %s32_s19, %s32_s19 }
   0x6   :  { %p473_p0 = scmp.ne.s32.totalorder %s32_s19, %s472_s20  ;;  %p478_p2 = scmp.lt.s32.totalorder %s472_s20, %s472_s20 }
   0x8   :  { %p479_p3 = por %p478_p2, %p477_p1 }
   0xa   :  { %p480_p4 = pnand %p479_p3, %p473_p0 }
   0xc   :  { %483 = shalt.err (!%p480_p4)
}
   0xd   :  { %s573_s21 = smov 64   ;;  %s574_s22 = smov 4  }
   0xe   :  { %37 = dma.hbm_to_vmem [thread:$0]  %s652_s1, 256, %s32_s19, [#allocation8], %s573_s21, %s573_s21, %s574_s22  }
   0xf   :  { %s575_s25 = smov [#allocation4]  }
  0x10   :  { %s19_s26 = sshll.u32 %s575_s25, 4  ;;  %s20_s26 = int_to_ptr.vmem [resolvable:$true] %s19_s26 }
  0x11   :  { %s492_s27 = scalar_lea.vmem %s20_s26, 256  ;;  %p497_p6 = scmp.lt.s32.totalorder %s20_s26, %s20_s26 }
  0x12   :  { %p493_p5 = scmp.ne.s32.totalorder %s20_s26, %s492_s27  ;;  %p498_p7 = scmp.lt.s32.totalorder %s492_s27, %s492_s27 }
  0x14   :  { %p499_p8 = por %p498_p7, %p497_p6 }
  0x16   :  { %p500_p9 = pnand %p499_p8, %p493_p5 }
  0x18   :  { %503 = shalt.err (!%p500_p9)
}
  0x19   :  { %s576_s28 = smov 128   ;;  %s577_s29 = smov 8  }
  0x1a   :  { %25 = dma.hbm_to_vmem [thread:$0]  %s651_s0, 256, %s20_s26, [#allocation5], %s576_s28, %s576_s28, %s577_s29  }
  0x1b   :  { %s578_s1 = smov [#allocation9]   ;;  %s579_s8 = smov [#allocation10]  }
  0x1c   :  { %s45_s7 = sshll.u32 %s578_s1, 4  ;;  %s57_s9 = sshll.u32 %s579_s8, 4  ;;  %s46_s7 = int_to_ptr.vmem [resolvable:$true] %s45_s7  ;;  %s58_s9 = int_to_ptr.vmem [resolvable:$true] %s57_s9 }
  0x1d   :  { %s512_s10 = scalar_lea.vmem %s46_s7, 256  ;;  %p517_p11 = scmp.lt.s32.totalorder %s46_s7, %s46_s7 }
  0x1e   :  { %p513_p10 = scmp.ne.s32.totalorder %s46_s7, %s512_s10  ;;  %p518_p12 = scmp.lt.s32.totalorder %s512_s10, %s512_s10 }
  0x20   :  { %p519_p13 = por %p518_p12, %p517_p11 }
  0x22   :  { %p520_p0 = pnand %p519_p13, %p513_p10 }
  0x24   :  { %523 = shalt.err (!%p520_p0)
}
  0x25   :  { %51 = dma.hbm_to_vmem [thread:$0]  %s654_s3, 256, %s46_s7, [#allocation8], %s573_s21, %s573_s21, %s574_s22  }
  0x26   :  { %s532_s0 = scalar_lea.vmem %s58_s9, 1024  ;;  %p537_p2 = scmp.lt.s32.totalorder %s58_s9, %s58_s9 }
  0x27   :  { %p533_p1 = scmp.ne.s32.totalorder %s58_s9, %s532_s0  ;;  %p538_p3 = scmp.lt.s32.totalorder %s532_s0, %s532_s0 }
  0x29   :  { %p539_p4 = por %p538_p3, %p537_p2 }
  0x2b   :  { %p540_p5 = pnand %p539_p4, %p533_p1 }
  0x2d   :  { %543 = shalt.err (!%p540_p5)
}
  0x2e   :  { %63 = dma.hbm_to_vmem [thread:$0]  %s655_s4, 1024, %s58_s9, [#allocation11], %s573_s21, %s573_s21, %s574_s22  }
  0x2f   :  { %564 = dma.done.wait [#allocation5], 256  }
  0x30   :  { %565 = vsyncadd [#allocation5], 4294967040 }
  0x31   :  { %566 = dma.done.wait [#allocation8], 512  }
  0x32   :  { %567 = vsyncadd [#allocation8], 4294966784 }
  0x33   :  { %568 = dma.done.wait [#allocation11], 1024  }
  0x34   :  { %569 = vsyncadd [#allocation11], 4294966272  ;;  %v580_v0 = vmov 0.0   ;;  %vm581_vm0 = vmmov 0   ;;  %v452_v1 = vld [vmem:[#allocation9 + $0x8] sm:$0xff]   ;;  %v453_v2 = vld [vmem:[#allocation9] sm:$0xff]  }
  0x35   :  { %405 = vmatprep.subr.bf16.mxu1 %v580_v0  ;;  %409 = vmatprep.mubr.msk.bf16.mxu1 %vm581_vm0, %v580_v0  ;;  %v77_v3 = vld [vmem:[#allocation4] sm:$0xff]  ;;  %v78_v4 = vld [vmem:[#allocation4 + $0x8] sm:$0xff]  ;;  %vm114_vm1 = vcmask 261120   ;;  %v459_v8 = vld [vmem:[#allocation7 + $0x8] sm:$0xff]   ;;  %s582_s15 = smov [#allocation12]  }
  0x36   :  { %421 = vmatprep.subr.bf16.mxu0 %v580_v0  ;;  %437 = vmatprep.mubr.msk.bf16.mxu0 %vm581_vm0, %v580_v0  ;;  %v454_v5 = vld [vmem:[#allocation10 + $0x38] sm:$0xff]   ;;  %v79_v6 = vpack.c.bf16 %v78_v4, %v77_v3  ;;  %v455_v7 = vld [vmem:[#allocation10 + $0x30] sm:$0xff]   ;;  %v456_v9 = vld [vmem:[#allocation10 + $0x28] sm:$0xff]   ;;  %s361_s16 = sshll.u32 %s582_s15, 4  ;;  %s362_s16 = int_to_ptr.vmem [resolvable:$true] %s361_s16 }
  0x37   :  { %406 = vmatpush3.bf16.msra.mxu1 %v452_v1  ;;  %422 = vmatpush3.bf16.msra.mxu0 %v454_v5  ;;  %v461_v10 = vld [vmem:[#allocation7] sm:$0xff]   ;;  %v458_v12 = vld [vmem:[#allocation10 + $0x18] sm:$0xff]   ;;  %v460_v13 = vld [vmem:[#allocation10 + $0x10] sm:$0xff]   ;;  %s544_s17 = scalar_lea.vmem %s362_s16, 256  ;;  %p549_p7 = scmp.lt.s32.totalorder %s362_s16, %s362_s16 }
  0x38   :  { %407 = vmatprep.subr.bf16.mxu1 %v580_v0  ;;  %423 = vmatprep.subr.bf16.mxu0 %v580_v0  ;;  %v457_v11 = vld [vmem:[#allocation10 + $0x20] sm:$0xff]   ;;  %v462_v14 = vld [vmem:[#allocation10 + $0x8] sm:$0xff]   ;;  %v389_v26 = vld [vmem:[%s653_s2] ss:$0 sm:$0xff]  ;;  %p545_p6 = scmp.ne.s32.totalorder %s362_s16, %s544_s17  ;;  %p550_p8 = scmp.lt.s32.totalorder %s544_s17, %s544_s17 }
  0x39   :  { %v463_v15 = vld [vmem:[#allocation10] sm:$0xff]  }
  0x3a   :  { %p551_p9 = por %p550_p8, %p549_p7 }
  0x3b   :  { %408 = vmatpush3.bf16.msra.mxu1 %v453_v2  ;;  %424 = vmatpush3.bf16.msra.mxu0 %v455_v7 }
  0x3c   :  { %413 = vmatprep.subr.bf16.mxu1 %v580_v0  ;;  %425 = vmatprep.subr.bf16.mxu0 %v580_v0  ;;  %p552_p10 = pnand %p551_p9, %p545_p6 }
  0x3e   :  { %410 = vmatmul.mubr.msk.bf16.vlgmr.msra.gmra.mxu1 %vm114_vm1, %v79_v6 }
  0x3f   :  { %414 = vmatpush3.bf16.msra.mxu1 %v459_v8  ;;  %417 = vmatprep.mubr.msk.bf16.mxu1 %vm581_vm0, %v580_v0 }
  0x40   :  { %415 = vmatprep.subr.bf16.mxu1 %v580_v0  ;;  %426 = vmatpush3.bf16.msra.mxu0 %v456_v9 }
  0x41   :  { %427 = vmatprep.subr.bf16.mxu0 %v580_v0 }
  0x43   :  { %416 = vmatpush3.bf16.msra.mxu1 %v461_v10 }
  0x44   :  { %428 = vmatpush3.bf16.msra.mxu0 %v457_v11 }
  0x45   :  { %429 = vmatprep.subr.bf16.mxu0 %v580_v0 }
  0x46   :  { %418 = vmatmul.mubr.msk.bf16.vlgmr.msra.gmra.mxu1 %vm114_vm1, %v79_v6 }
  0x48   :  { %430 = vmatpush3.bf16.msra.mxu0 %v458_v12 }
  0x49   :  { %431 = vmatprep.subr.bf16.mxu0 %v580_v0 }
  0x4c   :  { %432 = vmatpush3.bf16.msra.mxu0 %v460_v13 }
  0x4d   :  { %433 = vmatprep.subr.bf16.mxu0 %v580_v0 }
  0x50   :  { %434 = vmatpush3.bf16.msra.mxu0 %v462_v14 }
  0x51   :  { %435 = vmatprep.subr.bf16.mxu0 %v580_v0 }
  0x54   :  { %436 = vmatpush3.bf16.msra.mxu0 %v463_v15 }
  0xfe   :  { %v152_v16 = vpop.f32.mrf.mxu1 }
 0x100   :  { %v411_v17 = vpop.f32.mrf.mxu1 }
 0x102   :  { %v155_v18 = vpop.f32.mrf.mxu1 }
 0x103   :  { %v237_v19 = vpack.c.bf16 %v155_v18, %v152_v16 }
 0x104   :  { %v412_v20 = vpop.f32.mrf.mxu1 }
 0x105   :  { %438 = vmatmul.mubr.bf16.vlgmr.msra.gmra.mxu0 %v237_v19 }
 0x106   :  { %v219_v21 = vpop.f32.mrf.mxu1 }
 0x108   :  { %v419_v22 = vpop.f32.mrf.mxu1 }
 0x10a   :  { %v222_v23 = vpop.f32.mrf.mxu1 }
 0x10c   :  { %v420_v24 = vpop.f32.mrf.mxu1 }
 0x1c5   :  { %v336_v25 = vpop.f32.mrf.mxu0 }
 0x1c6   :  { %v343_v27 = vadd.f32 %v336_v25, %v219_v21 }
 0x1c7   :  { %v439_v28 = vpop.f32.mrf.mxu0 }
 0x1c8   :  { %v352_v29 = vadd.f32 %v389_v26, %v343_v27 }
 0x1c9   :  { %v339_v30 = vpop.f32.mrf.mxu0 }
 0x1ca   :  { %354 = vst [vmem:[#allocation12] sm:$0xff] %v352_v29  ;;  %v344_v31 = vadd.f32 %v339_v30, %v222_v23 }
 0x1cb   :  { %v440_v32 = vpop.f32.mrf.mxu0 }
 0x1cc   :  { %v353_v33 = vadd.f32 %v389_v26, %v344_v31 }
 0x1ce   :  { %355 = vst [vmem:[#allocation12 + $0x8] sm:$0xff] %v353_v33 }
 0x1cf   :  { %555 = shalt.err (!%p552_p10)
}
 0x1d0   :  { %367 = dma.vmem_to_hbm [thread:$0]  %s362_s16, 256, %s656_s5, [#allocation6], %s576_s28, %s576_s28, %s577_s29  }
 0x1d1   :  { %570 = dma.done.wait [#allocation6], 256  }
 0x1d2   :  { %571 = vsyncadd [#allocation6], 4294967040 }
 0x1d3   :  { %371 = vsyncpa [#allocation5], 1 }
 0x1d4   :  { %372 = vsyncpa [#allocation8], 1 }
 0x1d5   :  { %373 = vsyncpa [#allocation11], 1 }
 0x1d6   :  { %374 = vsyncpa [#allocation6], 1 }

</bundles_post_ra>
